<compile_context>
chip_gen: v5e
topology: v5e:2x2
jax: 0.10.0
libtpu: 0.0.40
codegen_flags: <defaults>
</compile_context>

<pallas_src>
import functools
import sys

import jax
import jax.numpy as jnp
from jax import lax
from jax.experimental import pallas as pl
from jax.experimental.pallas import tpu as pltpu

LRELU_SLOPE = 0.1
DILATIONS = (1, 3, 5)
K = 3  # kernel_size


# ------------------------------- kernel body --------------------------------
def resblock1_kernel(x_ref, w1_ref, b1_ref, w2_ref, b2_ref, o_ref, stack_ref,
                     *, seg_len, seg_stride, elementwise_bf16):
    """x_ref/o_ref: (C, L) f32 with L = G*seg_stride (G batch segments packed
    along lanes, each of padded length seg_stride and valid length seg_len).
    w*_ref: (3, C, 3C) bf16 — per-stage fused weights [tap0 | tap1 | tap2]
    along the contraction axis.  b*_ref: (3, C, 1) f32.
    stack_ref: persistent (3C, L) bf16 VMEM scratch reused by all 6 convs."""
    C, L = x_ref.shape
    compute_dtype = jnp.bfloat16 if elementwise_bf16 else jnp.float32
    x = x_ref[...]  # f32 residual stream

    # (1, L) boundary masks, broadcast over sublanes at the multiply.  One
    # iota + 6 compares per grid step; positions whose (t + shift) leaves
    # [0, seg_len) are zeroed, reproducing Conv1d's "same" zero padding and
    # isolating the packed / zero-padded segments from each other.
    t = lax.broadcasted_iota(jnp.int32, (1, L), 1) % seg_stride
    masks = {
        s: ((t + s >= 0) & (t + s < seg_len)).astype(compute_dtype)
        for dd in set(DILATIONS) | {1} for s in (-dd, dd)
    }

    def conv3(v, w, b, d):
        # Fused 3-tap dilated conv: one (C, 3C) @ (3C, L) bf16 MXU matmul fed
        # from the persistent scratch (no concatenate temporaries), f32
        # accumulation; bias added once on the f32 result.
        # roll(v, shift=d)[p]  == v[p - d];  roll(v, shift=-d)[p] == v[p + d].
        stack_ref[0:C, :] = (pltpu.roll(v, shift=d % L, axis=1)
                             * masks[-d]).astype(jnp.bfloat16)          # v[p-d]
        stack_ref[C:2 * C, :] = v.astype(jnp.bfloat16)                   # v[p]
        stack_ref[2 * C:3 * C, :] = (pltpu.roll(v, shift=(-d) % L, axis=1)
                                     * masks[d]).astype(jnp.bfloat16)    # v[p+d]
        return jnp.dot(w, stack_ref[...],
                       preferred_element_type=jnp.float32) + b

    for i, d in enumerate(DILATIONS):
        xt = jnp.maximum(x, LRELU_SLOPE * x).astype(compute_dtype)    # leaky_relu
        xt = conv3(xt, w1_ref[i], b1_ref[i], d)                       # convs1[i]
        xt = jnp.maximum(xt, LRELU_SLOPE * xt).astype(compute_dtype)  # leaky_relu
        xt = conv3(xt, w2_ref[i], b2_ref[i], 1)                       # convs2[i]
        x = xt + x                                                    # residual (f32)

    o_ref[...] = x


# ----------------------------- wrapper helpers -------------------------------
def _round_up(n, m):
    return (n + m - 1) // m * m


def _pick_lane_group(batch, t_pad, max_lanes=2048):
    """Pick G (batch elements packed on lanes).  Skip packing entirely when T
    is already lane-dense; never collapse the grid below 2 steps if B >= 2."""
    if t_pad >= 256 and t_pad % 128 == 0:
        return 1
    best = 1
    for g in range(1, batch + 1):
        if batch % g != 0 or g * t_pad > max_lanes:
            continue
        if batch // g < 2 and batch >= 2:   # keep >= 2 grid steps (megacore/pipeline)
            continue
        best = g
    return best


def _elementwise_bf16_supported():
    """bf16 VALU exists on v6e / v7x; keep elementwise math in f32 elsewhere."""
    try:
        kind = jax.devices()[0].device_kind.lower()
    except Exception:  # detection failure -> safe f32 path
        return False
    return ("v6" in kind) or ("v7" in kind)


def _vmem_cap_bytes():
    try:
        return int(pltpu.get_tpu_info().vmem_capacity_bytes)
    except Exception:
        return 64 << 20  # conservative: v7x per-TC VMEM


def _vmem_limit_bytes(C, L, single_buffer_weights):
    wbuf = 1 if single_buffer_weights else 2
    est = (
        2 * 2 * C * L * 4                    # x + out blocks, double-buffered, f32
        + wbuf * 2 * (3 * C * 3 * C) * 2     # convs1 + convs2 weights, bf16
        + wbuf * 2 * (3 * C * 128) * 4       # biases (last dim pads to 128 lanes)
        + 3 * C * L * 2                      # (3C, L) bf16 stack scratch
        + 6 * C * L * 4                      # activation / roll temporaries headroom
    )
    cap = max(_vmem_cap_bytes() - (8 << 20), 32 << 20)   # headroom below physical
    return int(min(max(2 * est, 32 << 20), cap))


@functools.lru_cache(maxsize=1)
def _single_buffer_weights_supported():
    """Feature-detect pl.Buffered(1) with a compile-only probe (never executes,
    so genuine runtime faults in the real kernel are NOT swallowed)."""
    def _probe_kernel(x_ref, w_ref, o_ref):
        o_ref[...] = x_ref[...] + w_ref[...]

    try:
        probe = pl.pallas_call(
            _probe_kernel,
            out_shape=jax.ShapeDtypeStruct((2, 8, 128), jnp.float32),
            grid=(2,),
            in_specs=[
                pl.BlockSpec((None, 8, 128), lambda i: (i, 0, 0)),
                pl.BlockSpec((8, 128), lambda i: (0, 0),
                             pipeline_mode=pl.Buffered(1)),
            ],
            out_specs=pl.BlockSpec((None, 8, 128), lambda i: (i, 0, 0)),
        )
        jax.jit(probe).lower(
            jax.ShapeDtypeStruct((2, 8, 128), jnp.float32),
            jax.ShapeDtypeStruct((8, 128), jnp.float32),
        ).compile()
        return True
    except Exception:  # probe-only: feature unavailable on this jax/TPU combo
        print("resblock1_pallas: pl.Buffered(1) unavailable — weights will be "
              "double-buffered (2x weight VMEM).", file=sys.stderr, flush=True)
        return False


# --------------------------------- wrapper -----------------------------------
def resblock1_pallas(x, w1, b1, w2, b2):
    """x: (B, C, T) f32;  w1/w2: (3, C, 3C) bf16;  b1/b2: (3, C, 1) f32."""
    B, C, T = x.shape
    assert T > max(DILATIONS), "time axis must exceed the maximum dilation"

    # Pad T to a lane multiple (128) -> lane-dense (unmasked) output stores.
    # Padded positions are neutralized by the segment masks and sliced off.
    T_pad = _round_up(T, 128)
    if T_pad != T:
        x = jnp.pad(x, ((0, 0), (0, 0), (0, T_pad - T)))

    # Pack G batch elements along lanes only when T is not already lane-dense.
    G = _pick_lane_group(B, T_pad)
    NG, L = B // G, G * T_pad
    if G > 1:
        xp = x.reshape(NG, G, C, T_pad).transpose(0, 2, 1, 3).reshape(NG, C, L)
    else:
        xp = x  # no pack/unpack HBM round trips

    elementwise_bf16 = _elementwise_bf16_supported()
    single_buf = _single_buffer_weights_supported()
    wkw = dict(pipeline_mode=pl.Buffered(1)) if single_buf else {}

    kernel = functools.partial(resblock1_kernel, seg_len=T, seg_stride=T_pad,
                               elementwise_bf16=elementwise_bf16)

    call = pl.pallas_call(
        kernel,
        out_shape=jax.ShapeDtypeStruct((NG, C, L), jnp.float32),
        grid_spec=pltpu.PrefetchScalarGridSpec(
            num_scalar_prefetch=0,
            grid=(NG,),
            in_specs=[
                pl.BlockSpec((None, C, L), lambda g: (g, 0, 0)),          # packed x
                pl.BlockSpec((3, C, 3 * C), lambda g: (0, 0, 0), **wkw),  # convs1 W
                # NOTE: (3, C, 1) bias blocks pad their last dim to 128 lanes in
                # VMEM — acceptable here, tidy up when squeezing v7x's budget.
                pl.BlockSpec((3, C, 1), lambda g: (0, 0, 0), **wkw),      # convs1 b
                pl.BlockSpec((3, C, 3 * C), lambda g: (0, 0, 0), **wkw),  # convs2 W
                pl.BlockSpec((3, C, 1), lambda g: (0, 0, 0), **wkw),      # convs2 b
            ],
            out_specs=pl.BlockSpec((None, C, L), lambda g: (g, 0, 0)),
            scratch_shapes=[pltpu.VMEM((3 * C, L), jnp.bfloat16)],        # tap stack
        ),
        compiler_params=pltpu.CompilerParams(
            dimension_semantics=("parallel",),
            vmem_limit_bytes=_vmem_limit_bytes(C, L, single_buf)),
    )
    out_p = call(xp, w1, b1, w2, b2)

    if G > 1:
        out = out_p.reshape(NG, C, G, T_pad).transpose(0, 2, 1, 3).reshape(B, C, T_pad)
    else:
        out = out_p
    return out[:, :, :T] if T_pad != T else out


# ------------------------- parameter packing helpers -------------------------
def pack_conv_weights(w_list, dtype=jnp.bfloat16):
    """[(C_out, C_in, K)] * 3 (PyTorch OIW) -> (3, C_out, K*C_in), tap-major
    contraction, matching the [shift -d | shift 0 | shift +d] stack in-kernel."""
    packed = [w.transpose(0, 2, 1).reshape(w.shape[0], -1) for w in w_list]
    return jnp.stack(packed).astype(dtype)


def pack_conv_biases(b_list):
    return jnp.stack(b_list).astype(jnp.float32)[:, :, None]  # (3, C, 1)


# ---------------- pure-JAX reference (for correctness check) ----------------
def _leaky(x):
    return jnp.where(x > 0, x, LRELU_SLOPE * x)


def _conv1d_ref(x, w, b, dilation):
    """x: (B,C,T); w: (Cout,Cin,K) [PyTorch layout]; b: (Cout,). 'same' padding."""
    pad = dilation * (K - 1) // 2
    y = lax.conv_general_dilated(
        x, w, window_strides=(1,), padding=[(pad, pad)],
        rhs_dilation=(dilation,), dimension_numbers=("NCH", "OIH", "NCH"))
    return y + b[None, :, None]


def resblock1_ref(x, w1_list, b1_list, w2_list, b2_list):
    for i, d in enumerate(DILATIONS):
        xt = _leaky(x)
        xt = _conv1d_ref(xt, w1_list[i], b1_list[i], d)
        xt = _leaky(xt)
        xt = _conv1d_ref(xt, w2_list[i], b2_list[i], 1)
        x = xt + x
    return x


if __name__ == "__main__":
    key = jax.random.PRNGKey(0)
    B, C, T = 2, 16, 128

    # Deterministic synthetic parameters (Conv1d weight shape: (C_out, C_in, K)).
    # weight_norm is a train-time reparameterization; the kernel consumes the
    # effective conv weights directly.
    keys = jax.random.split(key, 13)
    w1_list = [0.01 * jax.random.normal(keys[i], (C, C, K), jnp.float32) for i in range(3)]
    w2_list = [0.01 * jax.random.normal(keys[3 + i], (C, C, K), jnp.float32) for i in range(3)]
    b1_list = [0.05 * jax.random.normal(keys[6 + i], (C,), jnp.float32) for i in range(3)]
    b2_list = [0.05 * jax.random.normal(keys[9 + i], (C,), jnp.float32) for i in range(3)]
    x = jax.random.normal(keys[12], (B, C, T), jnp.float32)

    w1_k = pack_conv_weights(w1_list)   # (3, C, 3C) bf16
    w2_k = pack_conv_weights(w2_list)   # (3, C, 3C) bf16
    b1_k = pack_conv_biases(b1_list)    # (3, C, 1)  f32
    b2_k = pack_conv_biases(b2_list)    # (3, C, 1)  f32

    out = resblock1_pallas(x, w1_k, b1_k, w2_k, b2_k)
    out = jax.block_until_ready(out)

    ref = resblock1_ref(x, w1_list, b1_list, w2_list, b2_list)
    max_err = float(jnp.max(jnp.abs(out - ref)))
    # bf16 MXU operands (f32 accumulate, f32 residual path): expect ~1e-3 abs
    # error vs the pure-f32 reference (inference-grade; not for weight_norm-
    # sensitive training checks).
    assert max_err < 2e-2, f"mismatch vs reference: {max_err}"

    print("KERNEL_OK")
</pallas_src>

<mosaic_0001>
module attributes {stable_mosaic.version = 11 : i64} {
  func.func @resblock1_kernel(%arg0: i32, %arg1: memref<1x16x128xf32, #tpu.memory_space<vmem>>, %arg2: memref<3x16x48xbf16, #tpu.memory_space<vmem>>, %arg3: memref<3x16x1xf32, #tpu.memory_space<vmem>>, %arg4: memref<3x16x48xbf16, #tpu.memory_space<vmem>>, %arg5: memref<3x16x1xf32, #tpu.memory_space<vmem>>, %arg6: memref<1x16x128xf32, #tpu.memory_space<vmem>>, %arg7: memref<48x128xbf16, #tpu.memory_space<vmem>>) attributes {dimension_semantics = [#tpu.dimension_semantics<parallel>], iteration_bounds = array<i64: 2>, scalar_prefetch = 0 : i64, scratch_operands = 1 : i64, tpu.core_type = #tpu.core_type<tc>, window_params = [{transform_indices = @transform_0, window_bounds = array<i64: 1, 16, 128>}, {pipeline_mode = #tpu.pipeline_mode<synchronous>, transform_indices = @transform_1, window_bounds = array<i64: 3, 16, 48>}, {pipeline_mode = #tpu.pipeline_mode<synchronous>, transform_indices = @transform_2, window_bounds = array<i64: 3, 16, 1>}, {pipeline_mode = #tpu.pipeline_mode<synchronous>, transform_indices = @transform_3, window_bounds = array<i64: 3, 16, 48>}, {pipeline_mode = #tpu.pipeline_mode<synchronous>, transform_indices = @transform_4, window_bounds = array<i64: 3, 16, 1>}, {transform_indices = @transform_5, window_bounds = array<i64: 1, 16, 128>}]} {
    %c0 = arith.constant 0 : index
    %c0_0 = arith.constant 0 : index
    %c0_1 = arith.constant 0 : index
    %0 = vector.load %arg1[%c0, %c0_0, %c0_1] : memref<1x16x128xf32, #tpu.memory_space<vmem>>, vector<1x16x128xf32>
    %1 = vector.shape_cast %0 : vector<1x16x128xf32> to vector<16x128xf32>
    %2 = tpu.iota {dimensions = array<i32: 1>} : vector<1x128xi32>
    %c128_i32 = arith.constant 128 : i32
    %c0_i32 = arith.constant 0 : i32
    %3 = arith.cmpi eq, %c128_i32, %c0_i32 : i32
    %c1_i32 = arith.constant 1 : i32
    %4 = arith.select %3, %c1_i32, %c128_i32 : i32
    %5 = vector.broadcast %4 : i32 to vector<1x128xi32>
    %6 = arith.remsi %2, %5 : vector<1x128xi32>
    %c0_i32_2 = arith.constant 0 : i32
    %7 = vector.broadcast %c0_i32_2 : i32 to vector<1x128xi32>
    %8 = arith.cmpi ne, %6, %7 : vector<1x128xi32>
    %c0_i32_3 = arith.constant 0 : i32
    %9 = vector.broadcast %c0_i32_3 : i32 to vector<1x128xi32>
    %10 = arith.cmpi slt, %6, %9 : vector<1x128xi32>
    %c0_i32_4 = arith.constant 0 : i32
    %11 = arith.cmpi slt, %4, %c0_i32_4 : i32
    %12 = vector.broadcast %11 : i1 to vector<1x128xi1>
    %13 = vector.broadcast %12 : vector<1x128xi1> to vector<1x128xi1>
    %14 = arith.xori %10, %13 : vector<1x128xi1>
    %15 = arith.andi %14, %8 : vector<1x128xi1>
    %16 = vector.broadcast %4 : i32 to vector<1x128xi32>
    %17 = arith.addi %6, %16 : vector<1x128xi32>
    %18 = arith.select %15, %17, %6 : vector<1x128xi1>, vector<1x128xi32>
    %c-1_i32 = arith.constant -1 : i32
    %19 = vector.broadcast %c-1_i32 : i32 to vector<1x128xi32>
    %20 = arith.addi %18, %19 : vector<1x128xi32>
    %c0_i32_5 = arith.constant 0 : i32
    %21 = vector.broadcast %c0_i32_5 : i32 to vector<1x128xi32>
    %22 = arith.cmpi sge, %20, %21 : vector<1x128xi32>
    %c-1_i32_6 = arith.constant -1 : i32
    %23 = vector.broadcast %c-1_i32_6 : i32 to vector<1x128xi32>
    %24 = arith.addi %18, %23 : vector<1x128xi32>
    %c128_i32_7 = arith.constant 128 : i32
    %25 = vector.broadcast %c128_i32_7 : i32 to vector<1x128xi32>
    %26 = arith.cmpi slt, %24, %25 : vector<1x128xi32>
    %27 = arith.andi %22, %26 : vector<1x128xi1>
    %28 = arith.extui %27 : vector<1x128xi1> to vector<1x128xi32>
    %29 = arith.sitofp %28 : vector<1x128xi32> to vector<1x128xf32>
    %c1_i32_8 = arith.constant 1 : i32
    %30 = vector.broadcast %c1_i32_8 : i32 to vector<1x128xi32>
    %31 = arith.addi %18, %30 : vector<1x128xi32>
    %c0_i32_9 = arith.constant 0 : i32
    %32 = vector.broadcast %c0_i32_9 : i32 to vector<1x128xi32>
    %33 = arith.cmpi sge, %31, %32 : vector<1x128xi32>
    %c1_i32_10 = arith.constant 1 : i32
    %34 = vector.broadcast %c1_i32_10 : i32 to vector<1x128xi32>
    %35 = arith.addi %18, %34 : vector<1x128xi32>
    %c128_i32_11 = arith.constant 128 : i32
    %36 = vector.broadcast %c128_i32_11 : i32 to vector<1x128xi32>
    %37 = arith.cmpi slt, %35, %36 : vector<1x128xi32>
    %38 = arith.andi %33, %37 : vector<1x128xi1>
    %39 = arith.extui %38 : vector<1x128xi1> to vector<1x128xi32>
    %40 = arith.sitofp %39 : vector<1x128xi32> to vector<1x128xf32>
    %c-3_i32 = arith.constant -3 : i32
    %41 = vector.broadcast %c-3_i32 : i32 to vector<1x128xi32>
    %42 = arith.addi %18, %41 : vector<1x128xi32>
    %c0_i32_12 = arith.constant 0 : i32
    %43 = vector.broadcast %c0_i32_12 : i32 to vector<1x128xi32>
    %44 = arith.cmpi sge, %42, %43 : vector<1x128xi32>
    %c-3_i32_13 = arith.constant -3 : i32
    %45 = vector.broadcast %c-3_i32_13 : i32 to vector<1x128xi32>
    %46 = arith.addi %18, %45 : vector<1x128xi32>
    %c128_i32_14 = arith.constant 128 : i32
    %47 = vector.broadcast %c128_i32_14 : i32 to vector<1x128xi32>
    %48 = arith.cmpi slt, %46, %47 : vector<1x128xi32>
    %49 = arith.andi %44, %48 : vector<1x128xi1>
    %50 = arith.extui %49 : vector<1x128xi1> to vector<1x128xi32>
    %51 = arith.sitofp %50 : vector<1x128xi32> to vector<1x128xf32>
    %c3_i32 = arith.constant 3 : i32
    %52 = vector.broadcast %c3_i32 : i32 to vector<1x128xi32>
    %53 = arith.addi %18, %52 : vector<1x128xi32>
    %c0_i32_15 = arith.constant 0 : i32
    %54 = vector.broadcast %c0_i32_15 : i32 to vector<1x128xi32>
    %55 = arith.cmpi sge, %53, %54 : vector<1x128xi32>
    %c3_i32_16 = arith.constant 3 : i32
    %56 = vector.broadcast %c3_i32_16 : i32 to vector<1x128xi32>
    %57 = arith.addi %18, %56 : vector<1x128xi32>
    %c128_i32_17 = arith.constant 128 : i32
    %58 = vector.broadcast %c128_i32_17 : i32 to vector<1x128xi32>
    %59 = arith.cmpi slt, %57, %58 : vector<1x128xi32>
    %60 = arith.andi %55, %59 : vector<1x128xi1>
    %61 = arith.extui %60 : vector<1x128xi1> to vector<1x128xi32>
    %62 = arith.sitofp %61 : vector<1x128xi32> to vector<1x128xf32>
    %c-5_i32 = arith.constant -5 : i32
    %63 = vector.broadcast %c-5_i32 : i32 to vector<1x128xi32>
    %64 = arith.addi %18, %63 : vector<1x128xi32>
    %c0_i32_18 = arith.constant 0 : i32
    %65 = vector.broadcast %c0_i32_18 : i32 to vector<1x128xi32>
    %66 = arith.cmpi sge, %64, %65 : vector<1x128xi32>
    %c-5_i32_19 = arith.constant -5 : i32
    %67 = vector.broadcast %c-5_i32_19 : i32 to vector<1x128xi32>
    %68 = arith.addi %18, %67 : vector<1x128xi32>
    %c128_i32_20 = arith.constant 128 : i32
    %69 = vector.broadcast %c128_i32_20 : i32 to vector<1x128xi32>
    %70 = arith.cmpi slt, %68, %69 : vector<1x128xi32>
    %71 = arith.andi %66, %70 : vector<1x128xi1>
    %72 = arith.extui %71 : vector<1x128xi1> to vector<1x128xi32>
    %73 = arith.sitofp %72 : vector<1x128xi32> to vector<1x128xf32>
    %c5_i32 = arith.constant 5 : i32
    %74 = vector.broadcast %c5_i32 : i32 to vector<1x128xi32>
    %75 = arith.addi %18, %74 : vector<1x128xi32>
    %c0_i32_21 = arith.constant 0 : i32
    %76 = vector.broadcast %c0_i32_21 : i32 to vector<1x128xi32>
    %77 = arith.cmpi sge, %75, %76 : vector<1x128xi32>
    %c5_i32_22 = arith.constant 5 : i32
    %78 = vector.broadcast %c5_i32_22 : i32 to vector<1x128xi32>
    %79 = arith.addi %18, %78 : vector<1x128xi32>
    %c128_i32_23 = arith.constant 128 : i32
    %80 = vector.broadcast %c128_i32_23 : i32 to vector<1x128xi32>
    %81 = arith.cmpi slt, %79, %80 : vector<1x128xi32>
    %82 = arith.andi %77, %81 : vector<1x128xi1>
    %83 = arith.extui %82 : vector<1x128xi1> to vector<1x128xi32>
    %84 = arith.sitofp %83 : vector<1x128xi32> to vector<1x128xf32>
    %cst = arith.constant 1.000000e-01 : f32
    %85 = vector.broadcast %cst : f32 to vector<16x128xf32>
    %86 = arith.mulf %85, %1 : vector<16x128xf32>
    %87 = arith.maximumf %1, %86 : vector<16x128xf32>
    %c0_24 = arith.constant 0 : index
    %c0_25 = arith.constant 0 : index
    %c0_26 = arith.constant 0 : index
    %88 = vector.load %arg2[%c0_24, %c0_25, %c0_26] : memref<3x16x48xbf16, #tpu.memory_space<vmem>>, vector<1x16x48xbf16>
    %89 = vector.shape_cast %88 : vector<1x16x48xbf16> to vector<16x48xbf16>
    %c0_27 = arith.constant 0 : index
    %c0_28 = arith.constant 0 : index
    %c0_29 = arith.constant 0 : index
    %90 = vector.load %arg3[%c0_27, %c0_28, %c0_29] : memref<3x16x1xf32, #tpu.memory_space<vmem>>, vector<1x16x1xf32>
    %91 = vector.shape_cast %90 : vector<1x16x1xf32> to vector<16x1xf32>
    %c1_i32_30 = arith.constant 1 : i32
    %92 = tpu.dynamic_rotate %87 by %c1_i32_30 dim 1 : vector<16x128xf32>, i32 -> vector<16x128xf32>
    %93 = vector.broadcast %29 : vector<1x128xf32> to vector<16x128xf32>
    %94 = arith.mulf %92, %93 : vector<16x128xf32>
    %95 = arith.truncf %94 : vector<16x128xf32> to vector<16x128xbf16>
    %c0_31 = arith.constant 0 : index
    %c0_32 = arith.constant 0 : index
    %96 = vector.load %arg7[%c0_31, %c0_32] : memref<48x128xbf16, #tpu.memory_space<vmem>>, vector<16x128xbf16>
    tpu.vector_store %arg7[%c0_31, %c0_32], %95 {strides = array<i32>} : memref<48x128xbf16, #tpu.memory_space<vmem>>, vector<16x128xbf16>,
    %97 = arith.truncf %87 : vector<16x128xf32> to vector<16x128xbf16>
    %c16 = arith.constant 16 : index
    %c0_33 = arith.constant 0 : index
    %98 = vector.load %arg7[%c16, %c0_33] : memref<48x128xbf16, #tpu.memory_space<vmem>>, vector<16x128xbf16>
    tpu.vector_store %arg7[%c16, %c0_33], %97 {strides = array<i32>} : memref<48x128xbf16, #tpu.memory_space<vmem>>, vector<16x128xbf16>,
    %c127_i32 = arith.constant 127 : i32
    %99 = tpu.dynamic_rotate %87 by %c127_i32 dim 1 : vector<16x128xf32>, i32 -> vector<16x128xf32>
    %100 = vector.broadcast %40 : vector<1x128xf32> to vector<16x128xf32>
    %101 = arith.mulf %99, %100 : vector<16x128xf32>
    %102 = arith.truncf %101 : vector<16x128xf32> to vector<16x128xbf16>
    %c32 = arith.constant 32 : index
    %c0_34 = arith.constant 0 : index
    %103 = vector.load %arg7[%c32, %c0_34] : memref<48x128xbf16, #tpu.memory_space<vmem>>, vector<16x128xbf16>
    tpu.vector_store %arg7[%c32, %c0_34], %102 {strides = array<i32>} : memref<48x128xbf16, #tpu.memory_space<vmem>>, vector<16x128xbf16>,
    %c0_35 = arith.constant 0 : index
    %c0_36 = arith.constant 0 : index
    %104 = vector.load %arg7[%c0_35, %c0_36] : memref<48x128xbf16, #tpu.memory_space<vmem>>, vector<48x128xbf16>
    %cst_37 = arith.constant dense<0.000000e+00> : vector<16x128xf32>
    %105 = tpu.matmul %89, %104, %cst_37 {dimension_numbers = #tpu.dot_dimension_numbers<[1], [0], [0], [1], [0, 0, 1, 1], [], []>} : vector<16x48xbf16>, vector<48x128xbf16>, vector<16x128xf32> -> vector<16x128xf32>
    %106 = vector.broadcast %91 : vector<16x1xf32> to vector<16x128xf32>
    %107 = arith.addf %105, %106 : vector<16x128xf32>
    %cst_38 = arith.constant 1.000000e-01 : f32
    %108 = vector.broadcast %cst_38 : f32 to vector<16x128xf32>
    %109 = arith.mulf %108, %107 : vector<16x128xf32>
    %110 = arith.maximumf %107, %109 : vector<16x128xf32>
    %c0_39 = arith.constant 0 : index
    %c0_40 = arith.constant 0 : index
    %c0_41 = arith.constant 0 : index
    %111 = vector.load %arg4[%c0_39, %c0_40, %c0_41] : memref<3x16x48xbf16, #tpu.memory_space<vmem>>, vector<1x16x48xbf16>
    %112 = vector.shape_cast %111 : vector<1x16x48xbf16> to vector<16x48xbf16>
    %c0_42 = arith.constant 0 : index
    %c0_43 = arith.constant 0 : index
    %c0_44 = arith.constant 0 : index
    %113 = vector.load %arg5[%c0_42, %c0_43, %c0_44] : memref<3x16x1xf32, #tpu.memory_space<vmem>>, vector<1x16x1xf32>
    %114 = vector.shape_cast %113 : vector<1x16x1xf32> to vector<16x1xf32>
    %c1_i32_45 = arith.constant 1 : i32
    %115 = tpu.dynamic_rotate %110 by %c1_i32_45 dim 1 : vector<16x128xf32>, i32 -> vector<16x128xf32>
    %116 = vector.broadcast %29 : vector<1x128xf32> to vector<16x128xf32>
    %117 = arith.mulf %115, %116 : vector<16x128xf32>
    %118 = arith.truncf %117 : vector<16x128xf32> to vector<16x128xbf16>
    %c0_46 = arith.constant 0 : index
    %c0_47 = arith.constant 0 : index
    %119 = vector.load %arg7[%c0_46, %c0_47] : memref<48x128xbf16, #tpu.memory_space<vmem>>, vector<16x128xbf16>
    tpu.vector_store %arg7[%c0_46, %c0_47], %118 {strides = array<i32>} : memref<48x128xbf16, #tpu.memory_space<vmem>>, vector<16x128xbf16>,
    %120 = arith.truncf %110 : vector<16x128xf32> to vector<16x128xbf16>
    %c16_48 = arith.constant 16 : index
    %c0_49 = arith.constant 0 : index
    %121 = vector.load %arg7[%c16_48, %c0_49] : memref<48x128xbf16, #tpu.memory_space<vmem>>, vector<16x128xbf16>
    tpu.vector_store %arg7[%c16_48, %c0_49], %120 {strides = array<i32>} : memref<48x128xbf16, #tpu.memory_space<vmem>>, vector<16x128xbf16>,
    %c127_i32_50 = arith.constant 127 : i32
    %122 = tpu.dynamic_rotate %110 by %c127_i32_50 dim 1 : vector<16x128xf32>, i32 -> vector<16x128xf32>
    %123 = vector.broadcast %40 : vector<1x128xf32> to vector<16x128xf32>
    %124 = arith.mulf %122, %123 : vector<16x128xf32>
    %125 = arith.truncf %124 : vector<16x128xf32> to vector<16x128xbf16>
    %c32_51 = arith.constant 32 : index
    %c0_52 = arith.constant 0 : index
    %126 = vector.load %arg7[%c32_51, %c0_52] : memref<48x128xbf16, #tpu.memory_space<vmem>>, vector<16x128xbf16>
    tpu.vector_store %arg7[%c32_51, %c0_52], %125 {strides = array<i32>} : memref<48x128xbf16, #tpu.memory_space<vmem>>, vector<16x128xbf16>,
    %c0_53 = arith.constant 0 : index
    %c0_54 = arith.constant 0 : index
    %127 = vector.load %arg7[%c0_53, %c0_54] : memref<48x128xbf16, #tpu.memory_space<vmem>>, vector<48x128xbf16>
    %cst_55 = arith.constant dense<0.000000e+00> : vector<16x128xf32>
    %128 = tpu.matmul %112, %127, %cst_55 {dimension_numbers = #tpu.dot_dimension_numbers<[1], [0], [0], [1], [0, 0, 1, 1], [], []>} : vector<16x48xbf16>, vector<48x128xbf16>, vector<16x128xf32> -> vector<16x128xf32>
    %129 = vector.broadcast %114 : vector<16x1xf32> to vector<16x128xf32>
    %130 = arith.addf %128, %129 : vector<16x128xf32>
    %131 = arith.addf %130, %1 : vector<16x128xf32>
    %cst_56 = arith.constant 1.000000e-01 : f32
    %132 = vector.broadcast %cst_56 : f32 to vector<16x128xf32>
    %133 = arith.mulf %132, %131 : vector<16x128xf32>
    %134 = arith.maximumf %131, %133 : vector<16x128xf32>
    %c1 = arith.constant 1 : index
    %c0_57 = arith.constant 0 : index
    %c0_58 = arith.constant 0 : index
    %135 = vector.load %arg2[%c1, %c0_57, %c0_58] : memref<3x16x48xbf16, #tpu.memory_space<vmem>>, vector<1x16x48xbf16>
    %136 = vector.shape_cast %135 : vector<1x16x48xbf16> to vector<16x48xbf16>
    %c1_59 = arith.constant 1 : index
    %c0_60 = arith.constant 0 : index
    %c0_61 = arith.constant 0 : index
    %137 = vector.load %arg3[%c1_59, %c0_60, %c0_61] : memref<3x16x1xf32, #tpu.memory_space<vmem>>, vector<1x16x1xf32>
    %138 = vector.shape_cast %137 : vector<1x16x1xf32> to vector<16x1xf32>
    %c3_i32_62 = arith.constant 3 : i32
    %139 = tpu.dynamic_rotate %134 by %c3_i32_62 dim 1 : vector<16x128xf32>, i32 -> vector<16x128xf32>
    %140 = vector.broadcast %51 : vector<1x128xf32> to vector<16x128xf32>
    %141 = arith.mulf %139, %140 : vector<16x128xf32>
    %142 = arith.truncf %141 : vector<16x128xf32> to vector<16x128xbf16>
    %c0_63 = arith.constant 0 : index
    %c0_64 = arith.constant 0 : index
    %143 = vector.load %arg7[%c0_63, %c0_64] : memref<48x128xbf16, #tpu.memory_space<vmem>>, vector<16x128xbf16>
    tpu.vector_store %arg7[%c0_63, %c0_64], %142 {strides = array<i32>} : memref<48x128xbf16, #tpu.memory_space<vmem>>, vector<16x128xbf16>,
    %144 = arith.truncf %134 : vector<16x128xf32> to vector<16x128xbf16>
    %c16_65 = arith.constant 16 : index
    %c0_66 = arith.constant 0 : index
    %145 = vector.load %arg7[%c16_65, %c0_66] : memref<48x128xbf16, #tpu.memory_space<vmem>>, vector<16x128xbf16>
    tpu.vector_store %arg7[%c16_65, %c0_66], %144 {strides = array<i32>} : memref<48x128xbf16, #tpu.memory_space<vmem>>, vector<16x128xbf16>,
    %c125_i32 = arith.constant 125 : i32
    %146 = tpu.dynamic_rotate %134 by %c125_i32 dim 1 : vector<16x128xf32>, i32 -> vector<16x128xf32>
    %147 = vector.broadcast %62 : vector<1x128xf32> to vector<16x128xf32>
    %148 = arith.mulf %146, %147 : vector<16x128xf32>
    %149 = arith.truncf %148 : vector<16x128xf32> to vector<16x128xbf16>
    %c32_67 = arith.constant 32 : index
    %c0_68 = arith.constant 0 : index
    %150 = vector.load %arg7[%c32_67, %c0_68] : memref<48x128xbf16, #tpu.memory_space<vmem>>, vector<16x128xbf16>
    tpu.vector_store %arg7[%c32_67, %c0_68], %149 {strides = array<i32>} : memref<48x128xbf16, #tpu.memory_space<vmem>>, vector<16x128xbf16>,
    %c0_69 = arith.constant 0 : index
    %c0_70 = arith.constant 0 : index
    %151 = vector.load %arg7[%c0_69, %c0_70] : memref<48x128xbf16, #tpu.memory_space<vmem>>, vector<48x128xbf16>
    %cst_71 = arith.constant dense<0.000000e+00> : vector<16x128xf32>
    %152 = tpu.matmul %136, %151, %cst_71 {dimension_numbers = #tpu.dot_dimension_numbers<[1], [0], [0], [1], [0, 0, 1, 1], [], []>} : vector<16x48xbf16>, vector<48x128xbf16>, vector<16x128xf32> -> vector<16x128xf32>
    %153 = vector.broadcast %138 : vector<16x1xf32> to vector<16x128xf32>
    %154 = arith.addf %152, %153 : vector<16x128xf32>
    %cst_72 = arith.constant 1.000000e-01 : f32
    %155 = vector.broadcast %cst_72 : f32 to vector<16x128xf32>
    %156 = arith.mulf %155, %154 : vector<16x128xf32>
    %157 = arith.maximumf %154, %156 : vector<16x128xf32>
    %c1_73 = arith.constant 1 : index
    %c0_74 = arith.constant 0 : index
    %c0_75 = arith.constant 0 : index
    %158 = vector.load %arg4[%c1_73, %c0_74, %c0_75] : memref<3x16x48xbf16, #tpu.memory_space<vmem>>, vector<1x16x48xbf16>
    %159 = vector.shape_cast %158 : vector<1x16x48xbf16> to vector<16x48xbf16>
    %c1_76 = arith.constant 1 : index
    %c0_77 = arith.constant 0 : index
    %c0_78 = arith.constant 0 : index
    %160 = vector.load %arg5[%c1_76, %c0_77, %c0_78] : memref<3x16x1xf32, #tpu.memory_space<vmem>>, vector<1x16x1xf32>
    %161 = vector.shape_cast %160 : vector<1x16x1xf32> to vector<16x1xf32>
    %c1_i32_79 = arith.constant 1 : i32
    %162 = tpu.dynamic_rotate %157 by %c1_i32_79 dim 1 : vector<16x128xf32>, i32 -> vector<16x128xf32>
    %163 = vector.broadcast %29 : vector<1x128xf32> to vector<16x128xf32>
    %164 = arith.mulf %162, %163 : vector<16x128xf32>
    %165 = arith.truncf %164 : vector<16x128xf32> to vector<16x128xbf16>
    %c0_80 = arith.constant 0 : index
    %c0_81 = arith.constant 0 : index
    %166 = vector.load %arg7[%c0_80, %c0_81] : memref<48x128xbf16, #tpu.memory_space<vmem>>, vector<16x128xbf16>
    tpu.vector_store %arg7[%c0_80, %c0_81], %165 {strides = array<i32>} : memref<48x128xbf16, #tpu.memory_space<vmem>>, vector<16x128xbf16>,
    %167 = arith.truncf %157 : vector<16x128xf32> to vector<16x128xbf16>
    %c16_82 = arith.constant 16 : index
    %c0_83 = arith.constant 0 : index
    %168 = vector.load %arg7[%c16_82, %c0_83] : memref<48x128xbf16, #tpu.memory_space<vmem>>, vector<16x128xbf16>
    tpu.vector_store %arg7[%c16_82, %c0_83], %167 {strides = array<i32>} : memref<48x128xbf16, #tpu.memory_space<vmem>>, vector<16x128xbf16>,
    %c127_i32_84 = arith.constant 127 : i32
    %169 = tpu.dynamic_rotate %157 by %c127_i32_84 dim 1 : vector<16x128xf32>, i32 -> vector<16x128xf32>
    %170 = vector.broadcast %40 : vector<1x128xf32> to vector<16x128xf32>
    %171 = arith.mulf %169, %170 : vector<16x128xf32>
    %172 = arith.truncf %171 : vector<16x128xf32> to vector<16x128xbf16>
    %c32_85 = arith.constant 32 : index
    %c0_86 = arith.constant 0 : index
    %173 = vector.load %arg7[%c32_85, %c0_86] : memref<48x128xbf16, #tpu.memory_space<vmem>>, vector<16x128xbf16>
    tpu.vector_store %arg7[%c32_85, %c0_86], %172 {strides = array<i32>} : memref<48x128xbf16, #tpu.memory_space<vmem>>, vector<16x128xbf16>,
    %c0_87 = arith.constant 0 : index
    %c0_88 = arith.constant 0 : index
    %174 = vector.load %arg7[%c0_87, %c0_88] : memref<48x128xbf16, #tpu.memory_space<vmem>>, vector<48x128xbf16>
    %cst_89 = arith.constant dense<0.000000e+00> : vector<16x128xf32>
    %175 = tpu.matmul %159, %174, %cst_89 {dimension_numbers = #tpu.dot_dimension_numbers<[1], [0], [0], [1], [0, 0, 1, 1], [], []>} : vector<16x48xbf16>, vector<48x128xbf16>, vector<16x128xf32> -> vector<16x128xf32>
    %176 = vector.broadcast %161 : vector<16x1xf32> to vector<16x128xf32>
    %177 = arith.addf %175, %176 : vector<16x128xf32>
    %178 = arith.addf %177, %131 : vector<16x128xf32>
    %cst_90 = arith.constant 1.000000e-01 : f32
    %179 = vector.broadcast %cst_90 : f32 to vector<16x128xf32>
    %180 = arith.mulf %179, %178 : vector<16x128xf32>
    %181 = arith.maximumf %178, %180 : vector<16x128xf32>
    %c2 = arith.constant 2 : index
    %c0_91 = arith.constant 0 : index
    %c0_92 = arith.constant 0 : index
    %182 = vector.load %arg2[%c2, %c0_91, %c0_92] : memref<3x16x48xbf16, #tpu.memory_space<vmem>>, vector<1x16x48xbf16>
    %183 = vector.shape_cast %182 : vector<1x16x48xbf16> to vector<16x48xbf16>
    %c2_93 = arith.constant 2 : index
    %c0_94 = arith.constant 0 : index
    %c0_95 = arith.constant 0 : index
    %184 = vector.load %arg3[%c2_93, %c0_94, %c0_95] : memref<3x16x1xf32, #tpu.memory_space<vmem>>, vector<1x16x1xf32>
    %185 = vector.shape_cast %184 : vector<1x16x1xf32> to vector<16x1xf32>
    %c5_i32_96 = arith.constant 5 : i32
    %186 = tpu.dynamic_rotate %181 by %c5_i32_96 dim 1 : vector<16x128xf32>, i32 -> vector<16x128xf32>
    %187 = vector.broadcast %73 : vector<1x128xf32> to vector<16x128xf32>
    %188 = arith.mulf %186, %187 : vector<16x128xf32>
    %189 = arith.truncf %188 : vector<16x128xf32> to vector<16x128xbf16>
    %c0_97 = arith.constant 0 : index
    %c0_98 = arith.constant 0 : index
    %190 = vector.load %arg7[%c0_97, %c0_98] : memref<48x128xbf16, #tpu.memory_space<vmem>>, vector<16x128xbf16>
    tpu.vector_store %arg7[%c0_97, %c0_98], %189 {strides = array<i32>} : memref<48x128xbf16, #tpu.memory_space<vmem>>, vector<16x128xbf16>,
    %191 = arith.truncf %181 : vector<16x128xf32> to vector<16x128xbf16>
    %c16_99 = arith.constant 16 : index
    %c0_100 = arith.constant 0 : index
    %192 = vector.load %arg7[%c16_99, %c0_100] : memref<48x128xbf16, #tpu.memory_space<vmem>>, vector<16x128xbf16>
    tpu.vector_store %arg7[%c16_99, %c0_100], %191 {strides = array<i32>} : memref<48x128xbf16, #tpu.memory_space<vmem>>, vector<16x128xbf16>,
    %c123_i32 = arith.constant 123 : i32
    %193 = tpu.dynamic_rotate %181 by %c123_i32 dim 1 : vector<16x128xf32>, i32 -> vector<16x128xf32>
    %194 = vector.broadcast %84 : vector<1x128xf32> to vector<16x128xf32>
    %195 = arith.mulf %193, %194 : vector<16x128xf32>
    %196 = arith.truncf %195 : vector<16x128xf32> to vector<16x128xbf16>
    %c32_101 = arith.constant 32 : index
    %c0_102 = arith.constant 0 : index
    %197 = vector.load %arg7[%c32_101, %c0_102] : memref<48x128xbf16, #tpu.memory_space<vmem>>, vector<16x128xbf16>
    tpu.vector_store %arg7[%c32_101, %c0_102], %196 {strides = array<i32>} : memref<48x128xbf16, #tpu.memory_space<vmem>>, vector<16x128xbf16>,
    %c0_103 = arith.constant 0 : index
    %c0_104 = arith.constant 0 : index
    %198 = vector.load %arg7[%c0_103, %c0_104] : memref<48x128xbf16, #tpu.memory_space<vmem>>, vector<48x128xbf16>
    %cst_105 = arith.constant dense<0.000000e+00> : vector<16x128xf32>
    %199 = tpu.matmul %183, %198, %cst_105 {dimension_numbers = #tpu.dot_dimension_numbers<[1], [0], [0], [1], [0, 0, 1, 1], [], []>} : vector<16x48xbf16>, vector<48x128xbf16>, vector<16x128xf32> -> vector<16x128xf32>
    %200 = vector.broadcast %185 : vector<16x1xf32> to vector<16x128xf32>
    %201 = arith.addf %199, %200 : vector<16x128xf32>
    %cst_106 = arith.constant 1.000000e-01 : f32
    %202 = vector.broadcast %cst_106 : f32 to vector<16x128xf32>
    %203 = arith.mulf %202, %201 : vector<16x128xf32>
    %204 = arith.maximumf %201, %203 : vector<16x128xf32>
    %c2_107 = arith.constant 2 : index
    %c0_108 = arith.constant 0 : index
    %c0_109 = arith.constant 0 : index
    %205 = vector.load %arg4[%c2_107, %c0_108, %c0_109] : memref<3x16x48xbf16, #tpu.memory_space<vmem>>, vector<1x16x48xbf16>
    %206 = vector.shape_cast %205 : vector<1x16x48xbf16> to vector<16x48xbf16>
    %c2_110 = arith.constant 2 : index
    %c0_111 = arith.constant 0 : index
    %c0_112 = arith.constant 0 : index
    %207 = vector.load %arg5[%c2_110, %c0_111, %c0_112] : memref<3x16x1xf32, #tpu.memory_space<vmem>>, vector<1x16x1xf32>
    %208 = vector.shape_cast %207 : vector<1x16x1xf32> to vector<16x1xf32>
    %c1_i32_113 = arith.constant 1 : i32
    %209 = tpu.dynamic_rotate %204 by %c1_i32_113 dim 1 : vector<16x128xf32>, i32 -> vector<16x128xf32>
    %210 = vector.broadcast %29 : vector<1x128xf32> to vector<16x128xf32>
    %211 = arith.mulf %209, %210 : vector<16x128xf32>
    %212 = arith.truncf %211 : vector<16x128xf32> to vector<16x128xbf16>
    %c0_114 = arith.constant 0 : index
    %c0_115 = arith.constant 0 : index
    %213 = vector.load %arg7[%c0_114, %c0_115] : memref<48x128xbf16, #tpu.memory_space<vmem>>, vector<16x128xbf16>
    tpu.vector_store %arg7[%c0_114, %c0_115], %212 {strides = array<i32>} : memref<48x128xbf16, #tpu.memory_space<vmem>>, vector<16x128xbf16>,
    %214 = arith.truncf %204 : vector<16x128xf32> to vector<16x128xbf16>
    %c16_116 = arith.constant 16 : index
    %c0_117 = arith.constant 0 : index
    %215 = vector.load %arg7[%c16_116, %c0_117] : memref<48x128xbf16, #tpu.memory_space<vmem>>, vector<16x128xbf16>
    tpu.vector_store %arg7[%c16_116, %c0_117], %214 {strides = array<i32>} : memref<48x128xbf16, #tpu.memory_space<vmem>>, vector<16x128xbf16>,
    %c127_i32_118 = arith.constant 127 : i32
    %216 = tpu.dynamic_rotate %204 by %c127_i32_118 dim 1 : vector<16x128xf32>, i32 -> vector<16x128xf32>
    %217 = vector.broadcast %40 : vector<1x128xf32> to vector<16x128xf32>
    %218 = arith.mulf %216, %217 : vector<16x128xf32>
    %219 = arith.truncf %218 : vector<16x128xf32> to vector<16x128xbf16>
    %c32_119 = arith.constant 32 : index
    %c0_120 = arith.constant 0 : index
    %220 = vector.load %arg7[%c32_119, %c0_120] : memref<48x128xbf16, #tpu.memory_space<vmem>>, vector<16x128xbf16>
    tpu.vector_store %arg7[%c32_119, %c0_120], %219 {strides = array<i32>} : memref<48x128xbf16, #tpu.memory_space<vmem>>, vector<16x128xbf16>,
    %c0_121 = arith.constant 0 : index
    %c0_122 = arith.constant 0 : index
    %221 = vector.load %arg7[%c0_121, %c0_122] : memref<48x128xbf16, #tpu.memory_space<vmem>>, vector<48x128xbf16>
    %cst_123 = arith.constant dense<0.000000e+00> : vector<16x128xf32>
    %222 = tpu.matmul %206, %221, %cst_123 {dimension_numbers = #tpu.dot_dimension_numbers<[1], [0], [0], [1], [0, 0, 1, 1], [], []>} : vector<16x48xbf16>, vector<48x128xbf16>, vector<16x128xf32> -> vector<16x128xf32>
    %223 = vector.broadcast %208 : vector<16x1xf32> to vector<16x128xf32>
    %224 = arith.addf %222, %223 : vector<16x128xf32>
    %225 = arith.addf %224, %178 : vector<16x128xf32>
    %c0_124 = arith.constant 0 : index
    %c0_125 = arith.constant 0 : index
    %c0_126 = arith.constant 0 : index
    %226 = vector.load %arg6[%c0_124, %c0_125, %c0_126] : memref<1x16x128xf32, #tpu.memory_space<vmem>>, vector<1x16x128xf32>
    %227 = vector.shape_cast %226 : vector<1x16x128xf32> to vector<16x128xf32>
    %228 = vector.shape_cast %225 : vector<16x128xf32> to vector<1x16x128xf32>
    tpu.vector_store %arg6[%c0_124, %c0_125, %c0_126], %228 {strides = array<i32>} : memref<1x16x128xf32, #tpu.memory_space<vmem>>, vector<1x16x128xf32>,
    return
  }
  func.func @transform_0(%arg0: i32) -> (i32, i32, i32) {
    %c0_i32 = arith.constant 0 : i32
    %c0_i32_0 = arith.constant 0 : i32
    %c0_i32_1 = arith.constant 0 : i32
    return %arg0, %c0_i32, %c0_i32_0 : i32, i32, i32
  }
  func.func @transform_1(%arg0: i32) -> (i32, i32, i32) {
    %c0_i32 = arith.constant 0 : i32
    %c0_i32_0 = arith.constant 0 : i32
    %c0_i32_1 = arith.constant 0 : i32
    %c0_i32_2 = arith.constant 0 : i32
    return %c0_i32, %c0_i32_0, %c0_i32_1 : i32, i32, i32
  }
  func.func @transform_2(%arg0: i32) -> (i32, i32, i32) {
    %c0_i32 = arith.constant 0 : i32
    %c0_i32_0 = arith.constant 0 : i32
    %c0_i32_1 = arith.constant 0 : i32
    %c0_i32_2 = arith.constant 0 : i32
    return %c0_i32, %c0_i32_0, %c0_i32_1 : i32, i32, i32
  }
  func.func @transform_3(%arg0: i32) -> (i32, i32, i32) {
    %c0_i32 = arith.constant 0 : i32
    %c0_i32_0 = arith.constant 0 : i32
    %c0_i32_1 = arith.constant 0 : i32
    %c0_i32_2 = arith.constant 0 : i32
    return %c0_i32, %c0_i32_0, %c0_i32_1 : i32, i32, i32
  }
  func.func @transform_4(%arg0: i32) -> (i32, i32, i32) {
    %c0_i32 = arith.constant 0 : i32
    %c0_i32_0 = arith.constant 0 : i32
    %c0_i32_1 = arith.constant 0 : i32
    %c0_i32_2 = arith.constant 0 : i32
    return %c0_i32, %c0_i32_0, %c0_i32_1 : i32, i32, i32
  }
  func.func @transform_5(%arg0: i32) -> (i32, i32, i32) {
    %c0_i32 = arith.constant 0 : i32
    %c0_i32_0 = arith.constant 0 : i32
    %c0_i32_1 = arith.constant 0 : i32
    return %arg0, %c0_i32, %c0_i32_0 : i32, i32, i32
  }
}

</mosaic_0001>

<bundles_post_ra>
// kernel: tpu_custom_call.1
= control target key start
LH: loop header
LB: loop body
LE: loop exit
PB: predicated region body
PF: predicated region fallthrough
CT: control target
= control target key end

     0   :  { %10 = vsyncpa [#allocation4], 0  ;;  %s1544_s0 = inlined_call_operand.vmem [shape: f32[2,16,128], index: 0, kind: input, shape index: {}]   ;;  %s1545_s1 = inlined_call_operand.vmem [shape: bf16[3,16,48], index: 1, kind: input, shape index: {}]   ;;  %s1546_s2 = inlined_call_operand.vmem [shape: f32[3,16,1], index: 2, kind: input, shape index: {}]   ;;  %s1547_s3 = inlined_call_operand.vmem [shape: bf16[3,16,48], index: 3, kind: input, shape index: {}]   ;;  %s1548_s4 = inlined_call_operand.vmem [shape: f32[3,16,1], index: 4, kind: input, shape index: {}]   ;;  %s1549_s5 = inlined_call_operand.hbm [shape: f32[2,16,128], index: 5, kind: output, shape index: {}]  }
   0x1   :  { %12 = vsyncpa [#allocation4 + $0x1], 0  ;;  %s1319_s18 = smov 0   ;;  %s1321_s19 = smov 0  }
   0x2   :  { %s1323_s20 = smov 0   ;;  %s1325_s21 = smov 0  }
   0x3 LB: > { %s1340_s22 = sadd.s32 4294967295, %s1277_s21   ;;  %s899_s23 = sadd.s32 4294967294, %s1277_s21   ;;  %s1277_s21 = sphi %s1325_s21, %s1555_s21   ;;  %s1273_s20 = sphi %s1323_s20, %s1554_s20   ;;  %s1269_s19 = sphi %s1321_s19, %s1553_s19   ;;  %s1265_s18 = sphi %s1319_s18, %s1552_s18  }
   0x4   : > { %s1344_s24 = sadd.s32 1, %s1277_s21   ;;  %s135_s25 = sadd.s32 1, %s1273_s20 }
   0x5   : > { %s132_s26 = ssub.s32 %s1277_s21, %s1344_s24  ;;  %p145_p0 = scmp.ne.s32.totalorder %s1273_s20, %s1269_s19 }
   0x6   : > { %p133_p1 = scmp.eq.s32.totalorder %s132_s26, 0  ;;  %p146_p2 = scmp.eq.s32.totalorder %s1340_s22, 1 }
   0x7   : > { %p151_p3 = scmp.ne.s32.totalorder %s1269_s19, %s1265_s18  ;;  %p152_p4 = scmp.eq.s32.totalorder %s899_s23, 1 }
   0x8   : > { %s1355_s27 = scalar_select %p133_p1, %s1273_s20, %s135_s25  }
   0x9   : > { %p1357_p5 = por %p146_p2, %p145_p0  ;;  %p1361_p6 = por %p152_p4, %p151_p3 }
   0xa   : > { %p902_p7 = scmp.ge.s32.totalorder %s1277_s21, 1  ;;  %p190_p8 = scmp.lt.s32.totalorder %s1277_s21, 3 }
   0xc   : > { %p191_p9 = pnand %p902_p7, %p190_p8 }
   0xd   : > { %p218_p10 = scmp.lt.s32.totalorder (!%p191_p9), %s1340_s22, 1  ;;  %s1279_s10 = smov (!%p191_p9), 1  }
   0xe   : > { %194 = sbr.rel (%p191_p9) target bundleno = 1723 (0x6bb), region = 40  ;;  %s1280_s11 = smov (!%p191_p9), 127  }
   0xf   : > { %s1283_s8 = smov (!%p191_p9), 3  }
  0x13   : > { %s219_s30 = scalar_select %p218_p10, %s1340_s22, 1  ;;  %v226_v7 = vlaneseq  ;;  %v282_v13 = vld [vmem:[%s1546_s2] sm:$0xff]  ;;  %v1281_v14 = vmov 0   ;;  %v1282_v15 = vmov 0.0   ;;  %v283_v24 = vld [vmem:[%s1546_s2 + $0x8] sm:$0xff]  ;;  %vm347_vm2 = vcmask 392192  }
  0x14   : > { %1212 = vset.pattern.permute.xlu2 %v1281_v14  ;;  %1213 = vset.pattern.permute.xlu1 %v1281_v14  ;;  %v1036_v30 = vld [vmem:[%s1545_s1] sm:$0xff]  ;;  %v372_v40 = vld [vmem:[%s1548_s4 + $0x8] sm:$0xff] }
  0x15   : > { %s1035_s6 = sshll.u32 %s219_s30, 4  ;;  %v1384_v8 = vand.u32 127, %v226_v7  ;;  %316 = vperm.xlu2 %1212, %v282_v13   ;;  %1214 = vset.pattern.permute.xlu0 %v1281_v14  ;;  %v371_v44 = vld [vmem:[%s1548_s4] sm:$0xff]  ;;  %s1235_s30 = scalar_lea.hbm %s1549_s5, 32 }
  0x16   : > { %s222_s9 = scalar_lea.vmem %s1544_s0, %s1035_s6  ;;  %v1040_v57 = vld [vmem:[%s1547_s3] sm:$0xff]  ;;  %s215_s6 = sand.u32 1, %s1269_s19  }
  0x17   : > { %v1372_v0 = vld [vmem:[%s222_s9] sm:$0xff]  ;;  %v1374_v1 = vld [vmem:[%s222_s9 + $0x8] sm:$0xff]  ;;  %v240_v9 = vadd.s32 4294967295, %v1384_v8  ;;  %v246_v10 = vadd.s32 1, %v1384_v8  ;;  %s1284_s9 = smov 125   ;;  %s903_s7 = sshll.u32 %s215_s6, 4 }
  0x18   : > { %v276_v2 = vmul.f32 0.1, %v1372_v0  ;;  %v277_v3 = vmul.f32 0.1, %v1374_v1 }
  0x19   : > { %vm241_vm0 = vcmp.ge.s32.totalorder %v240_v9, 0  ;;  %vm248_vm1 = vcmp.lt.s32.totalorder %v246_v10, 128  ;;  %v948_v10 = vld [vmem:[%s1546_s2 + $0x10] sm:$0xff] }
  0x1a   : > { %v278_v4 = vmax.f32 %v1372_v0, %v276_v2  ;;  %v279_v5 = vmax.f32 %v1374_v1, %v277_v3  ;;  %v1392_v16 = vsel %vm241_vm0, 1.0, %v1282_v15  ;;  %v1395_v17 = vsel %vm248_vm1, 1.0, %v1282_v15 }
  0x1c   : > { %284 = vrot.lane.b32.xlu1 %v278_v4, %s1279_s10  ;;  %298 = vrot.lane.b32.xlu0 %v278_v4, %s1280_s11  ;;  %v1069_v6 = vpack.c.bf16 %v279_v5, %v278_v4 }
  0x1d   : > { %321 = vperm.xlu2 %1212, %v283_v24  }
  0x1e   : > { %1151 = vst [vmem:[#allocation2] sm:$0xff] %v1069_v6  }
  0x24   : > { %286 = vrot.lane.b32.xlu1 %v279_v5, %s1279_s10  ;;  %300 = vrot.lane.b32.xlu0 %v279_v5, %s1280_s11 }
  0x25   : > { %v1038_v28 = vld [vmem:[#allocation2] sm:$0xff] }
  0x6f   : > { %v317_v31 = vpop.permute.xlu2 %316 }
  0x77   : > { %v322_v36 = vpop.permute.xlu2 %321 }
  0x8e   : > { %v285_v11 = vpop.permute.xlu1 %284  ;;  %v299_v12 = vpop.permute.xlu0 %298 }
  0x8f   : > { %v288_v18 = vmul.f32 %v1392_v16, %v285_v11  ;;  %v302_v21 = vmul.f32 %v1395_v17, %v299_v12  ;;  %v252_v11 = vadd.s32 4294967293, %v1384_v8 }
  0x91   : > { %vm253_vm4 = vcmp.ge.s32.totalorder %v252_v11, 0  ;;  %v264_v11 = vadd.s32 4294967291, %v1384_v8 }
  0x92   : > { %v908_v14 = vsel %vm253_vm4, 1.0, %v1282_v15 }
  0x93   : > { %vm265_vm6 = vcmp.ge.s32.totalorder %v264_v11, 0 }
  0x96   : > { %v287_v19 = vpop.permute.xlu1 %286  ;;  %v301_v20 = vpop.permute.xlu0 %300 }
  0x97   : > { %v289_v22 = vmul.f32 %v1392_v16, %v287_v19  ;;  %v303_v23 = vmul.f32 %v1395_v17, %v301_v20 }
  0x99   : > { %v1064_v25 = vpack.c.bf16 %v289_v22, %v288_v18  ;;  %v1074_v26 = vpack.c.bf16 %v303_v23, %v302_v21 }
  0x9b   : > { %1065 = vst [vmem:[#allocation2 + $0x10] sm:$0xff] %v1064_v25  }
  0x9c   : > { %1152 = vst [vmem:[#allocation2 + $0x8] sm:$0xff] %v1074_v26  }
  0xa2   : > { %v1037_v29 = vld [vmem:[#allocation2 + $0x10] sm:$0xff] }
  0xa3   : > { %v1039_v27 = vld [vmem:[#allocation2 + $0x8] sm:$0xff] }
  0xa4   : > { %356 = vmatpush.bf16.msra.mxu0 %v1039_v27 }
  0xa8   : > { %357 = vmatpush.bf16.msra.mxu0 %v1038_v28 }
  0xac   : > { %358 = vmatpush.bf16.msra.mxu0 %v1037_v29 }
  0xaf   : > { %928 = vmatmul.msk.bf16.vlgmr.msra.gmra.mxu0 %vm347_vm2, %v1036_v30  ;;  %v1044_v30 = vld [vmem:[%s1545_s1 + $0x8] sm:$0xff] }
 0x12c   : > { %v360_v32 = vpop.f32.mrf.mxu0 }
 0x12d   : > { %v361_v33 = vadd.f32 %v360_v32, %v317_v31 }
 0x12f   : > { %v365_v34 = vmul.f32 0.1, %v361_v33 }
 0x131   : > { %v367_v35 = vmax.f32 %v361_v33, %v365_v34 }
 0x133   : > { %373 = vrot.lane.b32.xlu2 %v367_v35, %s1279_s10  ;;  %387 = vrot.lane.b32.xlu0 %v367_v35, %s1280_s11 }
 0x134   : > { %v362_v37 = vpop.f32.mrf.mxu0 }
 0x135   : > { %v363_v38 = vadd.f32 %v362_v37, %v322_v36 }
 0x137   : > { %v366_v39 = vmul.f32 0.1, %v363_v38 }
 0x139   : > { %v368_v41 = vmax.f32 %v363_v38, %v366_v39 }
 0x13b   : > { %v1084_v42 = vpack.c.bf16 %v368_v41, %v367_v35  ;;  %389 = vrot.lane.b32.xlu1 %v368_v41, %s1280_s11  ;;  %410 = vperm.xlu2 %1212, %v372_v40   ;;  %v970_v40 = vld [vmem:[%s1548_s4 + $0x18] sm:$0xff] }
 0x13c   : > { %375 = vrot.lane.b32.xlu0 %v368_v41, %s1279_s10 }
 0x13d   : > { %1153 = vst [vmem:[#allocation2] sm:$0xff] %v1084_v42  }
 0x143   : > { %405 = vperm.xlu1 %1213, %v371_v44  }
 0x144   : > { %v1042_v55 = vld [vmem:[#allocation2] sm:$0xff] }
 0x18d   : > { %v374_v45 = vpop.permute.xlu2 %373 }
 0x18e   : > { %v377_v50 = vmul.f32 %v1392_v16, %v374_v45 }
 0x195   : > { %v411_v2 = vpop.permute.xlu2 %410 }
 0x1a5   : > { %v388_v43 = vpop.permute.xlu0 %387 }
 0x1a6   : > { %v391_v47 = vmul.f32 %v1395_v17, %v388_v43  ;;  %v969_v43 = vld [vmem:[%s1548_s4 + $0x10] sm:$0xff] }
 0x1ad   : > { %v390_v46 = vpop.permute.xlu1 %389 }
 0x1ae   : > { %v392_v48 = vmul.f32 %v1395_v17, %v390_v46  ;;  %v376_v49 = vpop.permute.xlu0 %375 }
 0x1af   : > { %v378_v51 = vmul.f32 %v1392_v16, %v376_v49 }
 0x1b0   : > { %v1089_v52 = vpack.c.bf16 %v392_v48, %v391_v47 }
 0x1b1   : > { %v1079_v53 = vpack.c.bf16 %v378_v51, %v377_v50 }
 0x1b2   : > { %1154 = vst [vmem:[#allocation2 + $0x8] sm:$0xff] %v1089_v52  }
 0x1b3   : > { %1080 = vst [vmem:[#allocation2 + $0x10] sm:$0xff] %v1079_v53  }
 0x1b5   : > { %v406_v58 = vpop.permute.xlu1 %405 }
 0x1b9   : > { %v1043_v54 = vld [vmem:[#allocation2 + $0x8] sm:$0xff] }
 0x1ba   : > { %444 = vmatpush.bf16.msra.mxu1 %v1043_v54  ;;  %v1041_v56 = vld [vmem:[#allocation2 + $0x10] sm:$0xff] }
 0x1be   : > { %445 = vmatpush.bf16.msra.mxu1 %v1042_v55 }
 0x1c2   : > { %446 = vmatpush.bf16.msra.mxu1 %v1041_v56 }
 0x1c5   : > { %945 = vmatmul.msk.bf16.vlgmr.msra.gmra.mxu1 %vm347_vm2, %v1040_v57  ;;  %v1048_v57 = vld [vmem:[%s1547_s3 + $0x8] sm:$0xff] }
 0x242   : > { %v448_v59 = vpop.f32.mrf.mxu1 }
 0x243   : > { %v449_v60 = vadd.f32 %v448_v59, %v406_v58 }
 0x245   : > { %v1427_v61 = vadd.f32 %v449_v60, %v1372_v0  ;;  %v949_v0 = vld [vmem:[%s1546_s2 + $0x18] sm:$0xff] }
 0x247   : > { %v455_v62 = vmul.f32 0.1, %v1427_v61 }
 0x249   : > { %v457_v63 = vmax.f32 %v1427_v61, %v455_v62 }
 0x24a   : > { %v450_v3 = vpop.f32.mrf.mxu1 }
 0x24b   : > { %v451_v4 = vadd.f32 %v450_v3, %v411_v2  ;;  %465 = vrot.lane.b32.xlu2 %v457_v63, %s1283_s8  ;;  %479 = vrot.lane.b32.xlu0 %v457_v63, %s1284_s9 }
 0x24d   : > { %v1432_v5 = vadd.f32 %v451_v4, %v1374_v1  ;;  %v258_v1 = vadd.s32 3, %v1384_v8 }
 0x24f   : > { %v456_v6 = vmul.f32 0.1, %v1432_v5  ;;  %vm260_vm3 = vcmp.lt.s32.totalorder %v258_v1, 128  ;;  %v990_v1 = vld [vmem:[%s1546_s2 + $0x20] sm:$0xff] }
 0x250   : > { %v909_v13 = vsel %vm260_vm3, 1.0, %v1282_v15 }
 0x251   : > { %v458_v7 = vmax.f32 %v1432_v5, %v456_v6 }
 0x253   : > { %481 = vrot.lane.b32.xlu1 %v458_v7, %s1284_s9  ;;  %v1099_v9 = vpack.c.bf16 %v458_v7, %v457_v63  ;;  %502 = vperm.xlu2 %1212, %v949_v0   ;;  %s1286_s9 = smov 123  }
 0x254   : > { %467 = vrot.lane.b32.xlu0 %v458_v7, %s1283_s8  ;;  %s1285_s8 = smov 5  }
 0x255   : > { %1155 = vst [vmem:[#allocation2] sm:$0xff] %v1099_v9  }
 0x25b   : > { %497 = vperm.xlu1 %1213, %v948_v10  }
 0x25c   : > { %v1046_v28 = vld [vmem:[#allocation2] sm:$0xff] }
 0x2a5   : > { %v466_v18 = vpop.permute.xlu2 %465 }
 0x2a6   : > { %v469_v23 = vmul.f32 %v908_v14, %v466_v18 }
 0x2ad   : > { %v503_v36 = vpop.permute.xlu2 %502 }
 0x2bd   : > { %v480_v12 = vpop.permute.xlu0 %479 }
 0x2be   : > { %v483_v20 = vmul.f32 %v909_v13, %v480_v12 }
 0x2c5   : > { %v482_v19 = vpop.permute.xlu1 %481 }
 0x2c6   : > { %v484_v21 = vmul.f32 %v909_v13, %v482_v19  ;;  %v468_v22 = vpop.permute.xlu0 %467 }
 0x2c7   : > { %v470_v24 = vmul.f32 %v908_v14, %v468_v22  ;;  %v910_v14 = vsel %vm265_vm6, 1.0, %v1282_v15 }
 0x2c8   : > { %v1104_v25 = vpack.c.bf16 %v484_v21, %v483_v20 }
 0x2c9   : > { %v1094_v26 = vpack.c.bf16 %v470_v24, %v469_v23 }
 0x2ca   : > { %1156 = vst [vmem:[#allocation2 + $0x8] sm:$0xff] %v1104_v25  }
 0x2cb   : > { %1095 = vst [vmem:[#allocation2 + $0x10] sm:$0xff] %v1094_v26  }
 0x2cd   : > { %v498_v31 = vpop.permute.xlu1 %497 }
 0x2d1   : > { %v1047_v27 = vld [vmem:[#allocation2 + $0x8] sm:$0xff] }
 0x2d2   : > { %536 = vmatpush.bf16.msra.mxu2 %v1047_v27  ;;  %v1045_v29 = vld [vmem:[#allocation2 + $0x10] sm:$0xff] }
 0x2d6   : > { %537 = vmatpush.bf16.msra.mxu2 %v1046_v28 }
 0x2da   : > { %538 = vmatpush.bf16.msra.mxu2 %v1045_v29 }
 0x2dd   : > { %966 = vmatmul.msk.bf16.vlgmr.msra.gmra.mxu2 %vm347_vm2, %v1044_v30 }
 0x360   : > { %v540_v32 = vpop.f32.mrf.mxu2 }
 0x361   : > { %v541_v33 = vadd.f32 %v540_v32, %v498_v31 }
 0x363   : > { %v545_v34 = vmul.f32 0.1, %v541_v33 }
 0x365   : > { %v547_v35 = vmax.f32 %v541_v33, %v545_v34 }
 0x367   : > { %555 = vrot.lane.b32.xlu2 %v547_v35, %s1279_s10  ;;  %569 = vrot.lane.b32.xlu0 %v547_v35, %s1280_s11 }
 0x368   : > { %v542_v37 = vpop.f32.mrf.mxu2 }
 0x369   : > { %v543_v38 = vadd.f32 %v542_v37, %v503_v36 }
 0x36b   : > { %v546_v39 = vmul.f32 0.1, %v543_v38 }
 0x36d   : > { %v548_v41 = vmax.f32 %v543_v38, %v546_v39  ;;  %v1012_v38 = vld [vmem:[%s1548_s4 + $0x28] sm:$0xff] }
 0x36f   : > { %v1114_v42 = vpack.c.bf16 %v548_v41, %v547_v35  ;;  %571 = vrot.lane.b32.xlu1 %v548_v41, %s1280_s11  ;;  %592 = vperm.xlu2 %1212, %v970_v40  }
 0x370   : > { %557 = vrot.lane.b32.xlu0 %v548_v41, %s1279_s10  ;;  %v1011_v41 = vld [vmem:[%s1548_s4 + $0x20] sm:$0xff] }
 0x371   : > { %1157 = vst [vmem:[#allocation2] sm:$0xff] %v1114_v42  }
 0x377   : > { %587 = vperm.xlu1 %1213, %v969_v43  }
 0x378   : > { %v1050_v55 = vld [vmem:[#allocation2] sm:$0xff] }
 0x3c1   : > { %v556_v45 = vpop.permute.xlu2 %555 }
 0x3c2   : > { %v559_v50 = vmul.f32 %v1392_v16, %v556_v45 }
 0x3c9   : > { %v593_v3 = vpop.permute.xlu2 %592 }
 0x3d9   : > { %v570_v44 = vpop.permute.xlu0 %569 }
 0x3da   : > { %v573_v47 = vmul.f32 %v1395_v17, %v570_v44 }
 0x3e1   : > { %v572_v46 = vpop.permute.xlu1 %571 }
 0x3e2   : > { %v574_v48 = vmul.f32 %v1395_v17, %v572_v46  ;;  %v558_v49 = vpop.permute.xlu0 %557 }
 0x3e3   : > { %v560_v51 = vmul.f32 %v1392_v16, %v558_v49 }
 0x3e4   : > { %v1119_v52 = vpack.c.bf16 %v574_v48, %v573_v47 }
 0x3e5   : > { %v1109_v53 = vpack.c.bf16 %v560_v51, %v559_v50 }
 0x3e6   : > { %1158 = vst [vmem:[#allocation2 + $0x8] sm:$0xff] %v1119_v52  }
 0x3e7   : > { %1110 = vst [vmem:[#allocation2 + $0x10] sm:$0xff] %v1109_v53  }
 0x3e9   : > { %v588_v58 = vpop.permute.xlu1 %587 }
 0x3ed   : > { %v1051_v54 = vld [vmem:[#allocation2 + $0x8] sm:$0xff] }
 0x3ee   : > { %626 = vmatpush.bf16.msra.mxu3 %v1051_v54  ;;  %v1049_v56 = vld [vmem:[#allocation2 + $0x10] sm:$0xff] }
 0x3f2   : > { %627 = vmatpush.bf16.msra.mxu3 %v1050_v55 }
 0x3f6   : > { %628 = vmatpush.bf16.msra.mxu3 %v1049_v56 }
 0x3f9   : > { %987 = vmatmul.msk.bf16.vlgmr.msra.gmra.mxu3 %vm347_vm2, %v1048_v57 }
 0x47c   : > { %v630_v59 = vpop.f32.mrf.mxu3 }
 0x47d   : > { %v631_v60 = vadd.f32 %v630_v59, %v588_v58 }
 0x47f   : > { %v1469_v62 = vadd.f32 %v631_v60, %v1427_v61  ;;  %v991_v61 = vld [vmem:[%s1546_s2 + $0x28] sm:$0xff] }
 0x481   : > { %v637_v63 = vmul.f32 0.1, %v1469_v62 }
 0x483   : > { %v639_v2 = vmax.f32 %v1469_v62, %v637_v63 }
 0x484   : > { %v632_v4 = vpop.f32.mrf.mxu3 }
 0x485   : > { %v633_v6 = vadd.f32 %v632_v4, %v593_v3  ;;  %647 = vrot.lane.b32.xlu2 %v639_v2, %s1285_s8  ;;  %661 = vrot.lane.b32.xlu0 %v639_v2, %s1286_s9 }
 0x487   : > { %v1474_v0 = vadd.f32 %v633_v6, %v1432_v5  ;;  %v270_v5 = vadd.s32 5, %v1384_v8 }
 0x489   : > { %v638_v7 = vmul.f32 0.1, %v1474_v0  ;;  %vm272_vm5 = vcmp.lt.s32.totalorder %v270_v5, 128 }
 0x48a   : > { %v911_v13 = vsel %vm272_vm5, 1.0, %v1282_v15  ;;  %v1052_v15 = vld [vmem:[%s1545_s1 + $0x10] sm:$0xff] }
 0x48b   : > { %v640_v9 = vmax.f32 %v1474_v0, %v638_v7 }
 0x48d   : > { %663 = vrot.lane.b32.xlu1 %v640_v9, %s1286_s9  ;;  %v1129_v10 = vpack.c.bf16 %v640_v9, %v639_v2  ;;  %684 = vperm.xlu2 %1212, %v991_v61   ;;  %s217_s9 = scalar_lea.vmem [#allocation3], %s903_s7 }
 0x48e   : > { %649 = vrot.lane.b32.xlu0 %v640_v9, %s1285_s8  ;;  %s1060_s8 = sshll.u32 %s1340_s22, 4  ;;  %s834_s15 = sshll.u32 %s217_s9, 4  ;;  %s835_s15 = int_to_ptr.vmem [resolvable:$true] %s834_s15 }
 0x48f   : > { %1159 = vst [vmem:[#allocation2] sm:$0xff] %v1129_v10   ;;  %s833_s14 = scalar_lea.hbm %s1549_s5, %s1060_s8  ;;  %s822_s22 = scalar_lea.sflag [#allocation4], %s215_s6 }
 0x490   : > { %s836_s16 = sshll.u32 %s833_s14, 4  ;;  %s837_s16 = int_to_ptr.hbm [resolvable:$true] %s836_s16 }
 0x491   : > { %s1229_s17 = sshra.s32 %s837_s16, 4  ;;  %s1230_s17 = int_to_ptr.hbm [resolvable:$true] %s1229_s17 }
 0x492   : > { %s1231_s23 = scalar_lea.hbm %s1230_s17, 16  ;;  %p1236_p0 = scmp.lt.s32.totalorder %s1230_s17, %s1549_s5 }
 0x493   : > { %p1232_p11 = scmp.ne.s32.totalorder %s1230_s17, %s1231_s23  ;;  %p1237_p1 = scmp.lt.s32.totalorder %s1235_s30, %s1231_s23 }
 0x495   : > { %679 = vperm.xlu1 %1213, %v990_v1   ;;  %p1233_p12 = pnand %p1232_p11, %p1357_p5  ;;  %p1238_p2 = por %p1237_p1, %p1236_p0 }
 0x496   : > { %v1054_v8 = vld [vmem:[#allocation2] sm:$0xff] }
 0x497   : > { %p1234_p13 = pneg %p1233_p12 }
 0x499   : > { %p1239_p3 = pnand %p1238_p2, %p1234_p13 }
 0x4df   : > { %v648_v18 = vpop.permute.xlu2 %647 }
 0x4e0   : > { %v651_v23 = vmul.f32 %v910_v14, %v648_v18 }
 0x4e7   : > { %v685_v34 = vpop.permute.xlu2 %684 }
 0x4f7   : > { %v662_v12 = vpop.permute.xlu0 %661 }
 0x4f8   : > { %v665_v20 = vmul.f32 %v911_v13, %v662_v12 }
 0x4ff   : > { %v664_v19 = vpop.permute.xlu1 %663 }
 0x500   : > { %v666_v21 = vmul.f32 %v911_v13, %v664_v19  ;;  %v650_v22 = vpop.permute.xlu0 %649 }
 0x501   : > { %v652_v24 = vmul.f32 %v910_v14, %v650_v22 }
 0x502   : > { %v1134_v25 = vpack.c.bf16 %v666_v21, %v665_v20 }
 0x503   : > { %v1124_v26 = vpack.c.bf16 %v652_v24, %v651_v23 }
 0x504   : > { %1160 = vst [vmem:[#allocation2 + $0x8] sm:$0xff] %v1134_v25  }
 0x505   : > { %1125 = vst [vmem:[#allocation2 + $0x10] sm:$0xff] %v1124_v26  }
 0x507   : > { %v680_v29 = vpop.permute.xlu1 %679 }
 0x50b   : > { %v1055_v27 = vld [vmem:[#allocation2 + $0x8] sm:$0xff] }
 0x50c   : > { %718 = vmatpush.bf16.msrb.mxu0 %v1055_v27  ;;  %v1053_v28 = vld [vmem:[#allocation2 + $0x10] sm:$0xff] }
 0x510   : > { %719 = vmatpush.bf16.msrb.mxu0 %v1054_v8 }
 0x514   : > { %720 = vmatpush.bf16.msrb.mxu0 %v1053_v28 }
 0x517   : > { %1008 = vmatmul.msk.bf16.vlgmr.msrb.gmra.mxu0 %vm347_vm2, %v1052_v15 }
 0x594   : > { %v722_v30 = vpop.f32.mrf.mxu0 }
 0x595   : > { %v723_v31 = vadd.f32 %v722_v30, %v680_v29 }
 0x597   : > { %v727_v32 = vmul.f32 0.1, %v723_v31 }
 0x599   : > { %v729_v33 = vmax.f32 %v723_v31, %v727_v32 }
 0x59b   : > { %737 = vrot.lane.b32.xlu2 %v729_v33, %s1279_s10  ;;  %751 = vrot.lane.b32.xlu0 %v729_v33, %s1280_s11 }
 0x59c   : > { %v724_v35 = vpop.f32.mrf.mxu0 }
 0x59d   : > { %v725_v36 = vadd.f32 %v724_v35, %v685_v34 }
 0x59f   : > { %v728_v37 = vmul.f32 0.1, %v725_v36 }
 0x5a1   : > { %v730_v39 = vmax.f32 %v725_v36, %v728_v37 }
 0x5a3   : > { %v1144_v40 = vpack.c.bf16 %v730_v39, %v729_v33  ;;  %753 = vrot.lane.b32.xlu1 %v730_v39, %s1280_s11  ;;  %774 = vperm.xlu2 %1212, %v1012_v38  }
 0x5a4   : > { %739 = vrot.lane.b32.xlu0 %v730_v39, %s1279_s10 }
 0x5a5   : > { %1161 = vst [vmem:[#allocation2] sm:$0xff] %v1144_v40  }
 0x5ab   : > { %769 = vperm.xlu1 %1213, %v1011_v41  }
 0x5ac   : > { %v1058_v53 = vld [vmem:[#allocation2] sm:$0xff] }
 0x5f5   : > { %v738_v43 = vpop.permute.xlu2 %737 }
 0x5f6   : > { %v741_v48 = vmul.f32 %v1392_v16, %v738_v43 }
 0x5fd   : > { %v775_v58 = vpop.permute.xlu2 %774 }
 0x60d   : > { %v752_v42 = vpop.permute.xlu0 %751 }
 0x60e   : > { %v755_v45 = vmul.f32 %v1395_v17, %v752_v42 }
 0x615   : > { %v754_v44 = vpop.permute.xlu1 %753 }
 0x616   : > { %v756_v46 = vmul.f32 %v1395_v17, %v754_v44  ;;  %v740_v47 = vpop.permute.xlu0 %739  ;;  %v1056_v17 = vld [vmem:[%s1547_s3 + $0x10] sm:$0xff] }
 0x617   : > { %v742_v49 = vmul.f32 %v1392_v16, %v740_v47 }
 0x618   : > { %v1149_v50 = vpack.c.bf16 %v756_v46, %v755_v45 }
 0x619   : > { %v1139_v51 = vpack.c.bf16 %v742_v49, %v741_v48 }
 0x61a   : > { %1162 = vst [vmem:[#allocation2 + $0x8] sm:$0xff] %v1149_v50  }
 0x61b   : > { %1140 = vst [vmem:[#allocation2 + $0x10] sm:$0xff] %v1139_v51  }
 0x61d   : > { %v770_v16 = vpop.permute.xlu1 %769 }
 0x621   : > { %v1059_v52 = vld [vmem:[#allocation2 + $0x8] sm:$0xff] }
 0x622   : > { %808 = vmatpush.bf16.msrb.mxu1 %v1059_v52  ;;  %v1057_v54 = vld [vmem:[#allocation2 + $0x10] sm:$0xff] }
 0x626   : > { %809 = vmatpush.bf16.msrb.mxu1 %v1058_v53 }
 0x62a   : > { %810 = vmatpush.bf16.msrb.mxu1 %v1057_v54 }
 0x62d   : > { %1029 = vmatmul.msk.bf16.vlgmr.msrb.gmra.mxu1 %vm347_vm2, %v1056_v17 }
 0x6aa   : > { %v812_v55 = vpop.f32.mrf.mxu1 }
 0x6ab   : > { %v813_v56 = vadd.f32 %v812_v55, %v770_v16 }
 0x6ad   : > { %v817_v57 = vadd.f32 %v813_v56, %v1469_v62 }
 0x6af   : > { %819 = vst [vmem:[%s217_s9] sm:$0xff] %v817_v57 }
 0x6b2   : > { %v814_v59 = vpop.f32.mrf.mxu1 }
 0x6b3   : > { %v815_v60 = vadd.f32 %v814_v59, %v775_v58 }
 0x6b5   : > { %v818_v63 = vadd.f32 %v815_v60, %v1474_v0 }
 0x6b7   : > { %820 = vst [vmem:[%s217_s9 + $0x8] sm:$0xff] %v818_v63 }
 0x6b8   : > { %1242 = shalt.err (!%p1239_p3)
}
 0x6b9   : > { %s1287_s6 = smov 128   ;;  %s1288_s7 = smov 8  }
 0x6ba   : > { %1163 = dma.vmem_to_hbm [thread:$0]  (%p1357_p5), %s835_s15, 256, %s837_s16, %s822_s22, %s1287_s6, %s1287_s6, %s1288_s7  }
 0x6bb PF: > { %p1169_p4 = scmp.ge.s32.totalorder %s1277_s21, 2  ;;  %s851_s8 = sand.u32 1, %s1265_s18  }
 0x6bc   : > { %s852_s9 = scalar_lea.sflag [#allocation4], %s851_s8 }
 0x6bd   : > { %p1166_p7 = pnand %p1169_p4, %p1361_p6 }
 0x6bf   : > { %p1167_p8 = pneg %p1166_p7 }
 0x6c1   : > { %1260 = dma.done.wait (%p1167_p8), %s852_s9, 256  }
 0x6c2   : > { %1262 = vsyncadd (%p1167_p8), %s852_s9, 4294967040  ;;  %p15_p9 = scmp.ge.s32.totalorder %s1344_s24, 4   ;;  %s1552_s18 = smov %s1269_s19 }
 0x6c3   : > { %s1553_s19 = smov %s1273_s20  ;;  %s1554_s20 = smov %s1355_s27 }
 0x6c4   : > { %s1555_s21 = smov %s1344_s24  ;;  %17 = sbr.rel (!%p15_p9) target bundleno = 3 (0x3), region = 83 }
 0x6c9   :  { %858 = vsyncpa [#allocation4], 1 }
 0x6ca   :  { %860 = vsyncpa [#allocation4 + $0x1], 1 }

</bundles_post_ra>
